<compile_context>
chip_gen: v7x
topology: tpu7x:2x2x1
jax: 0.10.0
libtpu: 0.0.40
codegen_flags: <defaults>
</compile_context>

<pallas_src>
import jax
import jax.numpy as jnp
from jax.experimental import pallas as pl
from jax.experimental.pallas import tpu as pltpu


def _make_fused_gfe_kernel(num_layers):
    """Kernel fusing `num_layers` graph-conv layers for one batch element.

    Ref layout (per grid step n):
      refs[0]              x_ref   : (C, T*V)       input slab (lane-dense)
      refs[1]              abd_ref : (T*V, T*V)     kron(I_T, A), resident
      refs[2 + 2l]         w_ref_l : (O_l, C_l)     layer-l weight, resident
      refs[3 + 2l]         b_ref_l : (O_l, 1)       layer-l bias, resident
      refs[-1]             y_ref   : (O_last, T*V)  output slab
    """

    def kernel(*refs):
        x_ref, abd_ref = refs[0], refs[1]
        wb_refs = refs[2:2 + 2 * num_layers]
        y_ref = refs[2 + 2 * num_layers]

        cdt = x_ref.dtype
        a_bd = abd_ref[...]          # loaded once, reused by every layer
        h = x_ref[...]               # (C, T*V)

        for l in range(num_layers):
            w_ref = wb_refs[2 * l]
            b_ref = wb_refs[2 * l + 1]
            # Channel mix: lane-dense (O_l, T*V) result, f32 accumulation.
            z = jnp.dot(w_ref[...], h, preferred_element_type=jnp.float32)
            # Vertex aggregation: one K = T*V matmul against block-diag kron(I_T, A).
            z = jnp.dot(z.astype(cdt), a_bd, preferred_element_type=jnp.float32)
            z = jnp.maximum(z + b_ref[...].astype(jnp.float32), 0.0)
            # Keep compute dtype between layers; keep f32 for the final store.
            h = z.astype(cdt) if l + 1 < num_layers else z

        y_ref[...] = h.astype(y_ref.dtype)

    return kernel


def base_gfe_forward(x, A, layer_params, compute_dtype=jnp.float32):
    """Fused forward: relu(W_l @ . @ A + b_l) chained over layer_params.

    x: (N, C, T, V), A: (V, V), layer_params: list of (W: (O, C_in), b: (O,)).
    Returns (N, O_last, T, V) in x.dtype.
    """
    N, C, T, V = x.shape
    TV = T * V
    L = len(layer_params)
    O_last = layer_params[-1][0].shape[0]
    cdt = compute_dtype

    # Free reshapes / tiny host-side prep (no HBM transposes).
    x2 = x.reshape(N, C, TV).astype(cdt)
    A_bd = jnp.kron(jnp.eye(T, dtype=A.dtype), A).astype(cdt)   # (TV, TV) block-diag

    operands = [x2, A_bd]
    in_specs = [
        pl.BlockSpec((None, C, TV), lambda n: (n, 0, 0)),       # per-n slab
        pl.BlockSpec((TV, TV), lambda n: (0, 0)),               # kron(I_T, A), resident
    ]
    for (W, b) in layer_params:
        O, Ci = W.shape
        operands.append(W.astype(cdt))
        operands.append(b.reshape(O, 1).astype(cdt))
        in_specs.append(pl.BlockSpec((O, Ci), lambda n: (0, 0)))  # weight, resident
        in_specs.append(pl.BlockSpec((O, 1), lambda n: (0, 0)))   # bias, resident

    out = pl.pallas_call(
        _make_fused_gfe_kernel(L),
        out_shape=jax.ShapeDtypeStruct((N, O_last, TV), x.dtype),
        grid_spec=pltpu.PrefetchScalarGridSpec(
            num_scalar_prefetch=0,
            grid=(N,),
            in_specs=in_specs,
            out_specs=pl.BlockSpec((None, O_last, TV), lambda n: (n, 0, 0)),
        ),
        # N frames are independent -> megacore sharding on v7x; VMEM footprint
        # (A_bd + weights + a few (32, 256) tiles) is far below even v7x's 64 MiB.
        compiler_params=pltpu.CompilerParams(
            dimension_semantics=("parallel",)),
    )(*operands)

    return out.reshape(N, O_last, T, V)


class BaseGFE:
    """JAX/Pallas port of the PyTorch BaseGFE.forward (layers fused)."""

    def __init__(self, layer_params, num_person, num_classes, out_channels, key):
        self.num_person = num_person
        self.layer_params = layer_params  # list of (W: (O, C_in), b: (O,))
        # fc = nn.Conv2d(out_channels, num_classes, 1): only used by predict();
        # parameters initialized here for shape fidelity with __init__.
        kw, _ = jax.random.split(key)
        self.fc_w = 0.02 * jax.random.normal(
            kw, (num_classes, out_channels), jnp.float32)
        self.fc_b = jnp.zeros((num_classes,), jnp.float32)

    def forward(self, x, A, A_attention=None, compute_dtype=jnp.float32):
        # TODO(synk): the abstract layer's optional A_attention argument is
        # not modeled; the representative layer only consumes (x, A).
        return base_gfe_forward(x, A, self.layer_params, compute_dtype)


def _ref_layer(x, A, W, b):
    h = jnp.einsum('oc,nctv->notv', W, x)
    y = jnp.einsum('notv,vw->notw', h, A) + b.reshape(1, -1, 1, 1)
    return jnp.maximum(y, 0.0)


if __name__ == "__main__":
    key = jax.random.PRNGKey(0)
    k_x, k_a, k_w0, k_w1, k_fc = jax.random.split(key, 5)

    N, C_in, T, V = 2, 4, 16, 16
    out_channels = 32
    num_classes = 5
    num_person = 1

    # Deterministic inputs / parameters.
    x = jax.random.normal(k_x, (N, C_in, T, V), jnp.float32)
    A_raw = jax.random.uniform(k_a, (V, V), jnp.float32)
    A = A_raw / jnp.sum(A_raw, axis=0, keepdims=True)  # column-normalized adjacency

    def make_layer(k, c_in, c_out):
        kw, kb = jax.random.split(k)
        W = jax.random.normal(kw, (c_out, c_in), jnp.float32) * jnp.sqrt(2.0 / c_in)
        b = 0.01 * jax.random.normal(kb, (c_out,), jnp.float32)
        return W, b

    layer_params = [
        make_layer(k_w0, C_in, out_channels),
        make_layer(k_w1, out_channels, out_channels),
    ]

    model = BaseGFE(layer_params, num_person, num_classes, out_channels, k_fc)

    # Pure-JAX reference.
    x_ref = x
    for (W, b) in layer_params:
        x_ref = _ref_layer(x_ref, A, W, b)

    # float32 path: bit-for-bit-ish match with the reference.
    y = model.forward(x, A)
    y = jax.block_until_ready(y)
    assert y.shape == (N, out_channels, T, V)
    assert jnp.allclose(y, x_ref, atol=1e-4, rtol=1e-4), "f32 mismatch vs reference"

    # bf16 operand path (v6e/v7x MXU-native, f32 accumulation): loose check only.
    y_bf16 = model.forward(x, A, compute_dtype=jnp.bfloat16)
    y_bf16 = jax.block_until_ready(y_bf16)
    assert y_bf16.shape == (N, out_channels, T, V)
    assert jnp.allclose(y_bf16, x_ref, atol=1e-1, rtol=1e-1), "bf16 mismatch vs reference"

    print("KERNEL_OK")
</pallas_src>

<mosaic_0001>
module attributes {stable_mosaic.version = 11 : i64} {
  func.func @kernel(%arg0: i32, %arg1: memref<1x4x256xf32, #tpu.memory_space<vmem>>, %arg2: memref<256x256xf32, #tpu.memory_space<vmem>>, %arg3: memref<32x4xf32, #tpu.memory_space<vmem>>, %arg4: memref<32x1xf32, #tpu.memory_space<vmem>>, %arg5: memref<32x32xf32, #tpu.memory_space<vmem>>, %arg6: memref<32x1xf32, #tpu.memory_space<vmem>>, %arg7: memref<1x32x256xf32, #tpu.memory_space<vmem>>) attributes {dimension_semantics = [#tpu.dimension_semantics<parallel>], iteration_bounds = array<i64: 2>, scalar_prefetch = 0 : i64, scratch_operands = 0 : i64, tpu.core_type = #tpu.core_type<tc>, window_params = [{transform_indices = @transform_0, window_bounds = array<i64: 1, 4, 256>}, {pipeline_mode = #tpu.pipeline_mode<synchronous>, transform_indices = @transform_1, window_bounds = array<i64: 256, 256>}, {pipeline_mode = #tpu.pipeline_mode<synchronous>, transform_indices = @transform_2, window_bounds = array<i64: 32, 4>}, {pipeline_mode = #tpu.pipeline_mode<synchronous>, transform_indices = @transform_3, window_bounds = array<i64: 32, 1>}, {pipeline_mode = #tpu.pipeline_mode<synchronous>, transform_indices = @transform_4, window_bounds = array<i64: 32, 32>}, {pipeline_mode = #tpu.pipeline_mode<synchronous>, transform_indices = @transform_5, window_bounds = array<i64: 32, 1>}, {transform_indices = @transform_6, window_bounds = array<i64: 1, 32, 256>}]} {
    %c0 = arith.constant 0 : index
    %c0_0 = arith.constant 0 : index
    %0 = vector.load %arg2[%c0, %c0_0] : memref<256x256xf32, #tpu.memory_space<vmem>>, vector<256x256xf32>
    %c0_1 = arith.constant 0 : index
    %c0_2 = arith.constant 0 : index
    %c0_3 = arith.constant 0 : index
    %1 = vector.load %arg1[%c0_1, %c0_2, %c0_3] : memref<1x4x256xf32, #tpu.memory_space<vmem>>, vector<1x4x256xf32>
    %2 = vector.shape_cast %1 : vector<1x4x256xf32> to vector<4x256xf32>
    %c0_4 = arith.constant 0 : index
    %c0_5 = arith.constant 0 : index
    %3 = vector.load %arg3[%c0_4, %c0_5] : memref<32x4xf32, #tpu.memory_space<vmem>>, vector<32x4xf32>
    %cst = arith.constant dense<0.000000e+00> : vector<32x256xf32>
    %4 = tpu.matmul %3, %2, %cst {dimension_numbers = #tpu.dot_dimension_numbers<[1], [0], [0], [1], [0, 0, 1, 1], [], []>} : vector<32x4xf32>, vector<4x256xf32>, vector<32x256xf32> -> vector<32x256xf32>
    %cst_6 = arith.constant dense<0.000000e+00> : vector<32x256xf32>
    %5 = tpu.matmul %4, %0, %cst_6 {dimension_numbers = #tpu.dot_dimension_numbers<[1], [0], [0], [1], [0, 0, 1, 1], [], []>} : vector<32x256xf32>, vector<256x256xf32>, vector<32x256xf32> -> vector<32x256xf32>
    %c0_7 = arith.constant 0 : index
    %c0_8 = arith.constant 0 : index
    %6 = vector.load %arg4[%c0_7, %c0_8] : memref<32x1xf32, #tpu.memory_space<vmem>>, vector<32x1xf32>
    %7 = vector.broadcast %6 : vector<32x1xf32> to vector<32x256xf32>
    %8 = arith.addf %5, %7 : vector<32x256xf32>
    %cst_9 = arith.constant 0.000000e+00 : f32
    %9 = vector.broadcast %cst_9 : f32 to vector<32x256xf32>
    %10 = arith.maximumf %8, %9 : vector<32x256xf32>
    %c0_10 = arith.constant 0 : index
    %c0_11 = arith.constant 0 : index
    %11 = vector.load %arg5[%c0_10, %c0_11] : memref<32x32xf32, #tpu.memory_space<vmem>>, vector<32x32xf32>
    %cst_12 = arith.constant dense<0.000000e+00> : vector<32x256xf32>
    %12 = tpu.matmul %11, %10, %cst_12 {dimension_numbers = #tpu.dot_dimension_numbers<[1], [0], [0], [1], [0, 0, 1, 1], [], []>} : vector<32x32xf32>, vector<32x256xf32>, vector<32x256xf32> -> vector<32x256xf32>
    %cst_13 = arith.constant dense<0.000000e+00> : vector<32x256xf32>
    %13 = tpu.matmul %12, %0, %cst_13 {dimension_numbers = #tpu.dot_dimension_numbers<[1], [0], [0], [1], [0, 0, 1, 1], [], []>} : vector<32x256xf32>, vector<256x256xf32>, vector<32x256xf32> -> vector<32x256xf32>
    %c0_14 = arith.constant 0 : index
    %c0_15 = arith.constant 0 : index
    %14 = vector.load %arg6[%c0_14, %c0_15] : memref<32x1xf32, #tpu.memory_space<vmem>>, vector<32x1xf32>
    %15 = vector.broadcast %14 : vector<32x1xf32> to vector<32x256xf32>
    %16 = arith.addf %13, %15 : vector<32x256xf32>
    %cst_16 = arith.constant 0.000000e+00 : f32
    %17 = vector.broadcast %cst_16 : f32 to vector<32x256xf32>
    %18 = arith.maximumf %16, %17 : vector<32x256xf32>
    %c0_17 = arith.constant 0 : index
    %c0_18 = arith.constant 0 : index
    %c0_19 = arith.constant 0 : index
    %19 = vector.load %arg7[%c0_17, %c0_18, %c0_19] : memref<1x32x256xf32, #tpu.memory_space<vmem>>, vector<1x32x256xf32>
    %20 = vector.shape_cast %19 : vector<1x32x256xf32> to vector<32x256xf32>
    %21 = vector.shape_cast %18 : vector<32x256xf32> to vector<1x32x256xf32>
    tpu.vector_store %arg7[%c0_17, %c0_18, %c0_19], %21 {strides = array<i32>} : memref<1x32x256xf32, #tpu.memory_space<vmem>>, vector<1x32x256xf32>,
    return
  }
  func.func @transform_0(%arg0: i32) -> (i32, i32, i32) {
    %c0_i32 = arith.constant 0 : i32
    %c0_i32_0 = arith.constant 0 : i32
    %c0_i32_1 = arith.constant 0 : i32
    return %arg0, %c0_i32, %c0_i32_0 : i32, i32, i32
  }
  func.func @transform_1(%arg0: i32) -> (i32, i32) {
    %c0_i32 = arith.constant 0 : i32
    %c0_i32_0 = arith.constant 0 : i32
    %c0_i32_1 = arith.constant 0 : i32
    return %c0_i32, %c0_i32_0 : i32, i32
  }
  func.func @transform_2(%arg0: i32) -> (i32, i32) {
    %c0_i32 = arith.constant 0 : i32
    %c0_i32_0 = arith.constant 0 : i32
    %c0_i32_1 = arith.constant 0 : i32
    return %c0_i32, %c0_i32_0 : i32, i32
  }
  func.func @transform_3(%arg0: i32) -> (i32, i32) {
    %c0_i32 = arith.constant 0 : i32
    %c0_i32_0 = arith.constant 0 : i32
    %c0_i32_1 = arith.constant 0 : i32
    return %c0_i32, %c0_i32_0 : i32, i32
  }
  func.func @transform_4(%arg0: i32) -> (i32, i32) {
    %c0_i32 = arith.constant 0 : i32
    %c0_i32_0 = arith.constant 0 : i32
    %c0_i32_1 = arith.constant 0 : i32
    return %c0_i32, %c0_i32_0 : i32, i32
  }
  func.func @transform_5(%arg0: i32) -> (i32, i32) {
    %c0_i32 = arith.constant 0 : i32
    %c0_i32_0 = arith.constant 0 : i32
    %c0_i32_1 = arith.constant 0 : i32
    return %c0_i32, %c0_i32_0 : i32, i32
  }
  func.func @transform_6(%arg0: i32) -> (i32, i32, i32) {
    %c0_i32 = arith.constant 0 : i32
    %c0_i32_0 = arith.constant 0 : i32
    %c0_i32_1 = arith.constant 0 : i32
    return %arg0, %c0_i32, %c0_i32_0 : i32, i32, i32
  }
}

</mosaic_0001>

<bundles_post_ra>
// kernel: tpu_custom_call.1
= control target key start
LH: loop header
LB: loop body
LE: loop exit
PB: predicated region body
PF: predicated region fallthrough
CT: control target
= control target key end

     0   :  { %11 = vsyncpa [#allocation3], 0  ;;  %s1592_s0 = inlined_call_operand.vmem [shape: f32[2,4,256], index: 0, kind: input, shape index: {}]   ;;  %s1593_s1 = inlined_call_operand.hbm [shape: f32[256,256], index: 1, kind: input, shape index: {}]   ;;  %s1594_s2 = inlined_call_operand.vmem [shape: f32[32,4], index: 2, kind: input, shape index: {}]   ;;  %s1595_s3 = inlined_call_operand.vmem [shape: f32[32,1], index: 3, kind: input, shape index: {}]   ;;  %s1596_s4 = inlined_call_operand.vmem [shape: f32[32,32], index: 4, kind: input, shape index: {}]   ;;  %s1597_s5 = inlined_call_operand.vmem [shape: f32[32,1], index: 5, kind: input, shape index: {}]   ;;  %s1598_s6 = inlined_call_operand.hbm [shape: f32[2,32,256], index: 6, kind: output, shape index: {}]  }
   0x1   :  { %12 = vsyncpa [#allocation4], 0 }
   0x2   :  { %14 = vsyncpa [#allocation4 + $0x1], 0  ;;  %s1247_s21 = smov 0   ;;  %s1249_s22 = smov 0  }
   0x3   :  { %s1251_s23 = smov 0   ;;  %s1253_s24 = smov 0  }
   0x4 LB: > { %s1268_s25 = sadd.s32 4294967295, %s1202_s24   ;;  %s887_s26 = sadd.s32 4294967294, %s1202_s24   ;;  %s1202_s24 = sphi %s1253_s24, %s1614_s24   ;;  %s1198_s23 = sphi %s1251_s23, %s1613_s23   ;;  %s1194_s22 = sphi %s1249_s22, %s1612_s22   ;;  %s1190_s21 = sphi %s1247_s21, %s1611_s21  }
   0x5   : > { %s1272_s27 = sadd.s32 1, %s1202_s24   ;;  %s158_s28 = sadd.s32 1, %s1198_s23 }
   0x6   : > { %s155_s29 = ssub.s32 %s1202_s24, %s1272_s27  ;;  %p168_p0 = scmp.ne.s32.totalorder %s1198_s23, %s1194_s22 }
   0x7   : > { %p156_p1 = scmp.eq.s32.totalorder %s155_s29, 0  ;;  %p169_p2 = scmp.eq.s32.totalorder %s1268_s25, 1 }
   0x8   : > { %p174_p3 = scmp.ne.s32.totalorder %s1194_s22, %s1190_s21  ;;  %p175_p4 = scmp.eq.s32.totalorder %s887_s26, 1 }
   0x9   : > { %s1283_s30 = scalar_select %p156_p1, %s1198_s23, %s158_s28  }
   0xa   : > { %p1285_p5 = por %p169_p2, %p168_p0  ;;  %p1289_p6 = por %p175_p4, %p174_p3 }
   0xb   : > { %p888_p7 = scmp.ge.s32.totalorder %s1202_s24, 1  ;;  %p182_p8 = scmp.lt.s32.totalorder %s1202_s24, 3 }
   0xc   : > { %s1602_s7 = scalar_select %p1285_p5, 1, 0 }
   0xd   : > { %s1603_s8 = scalar_select %p1289_p6, 1, 0 }
   0xe   : > { %p1599_p9 = scmp.eq.s32.totalorder %s1268_s25, 0  ;;  %p1296_p10 = pnand %p888_p7, %p182_p8 }
   0xf   : > { %s1204_s10 = smov [#allocation2]   ;;  %s1108_s15 = scalar_lea.hbm %s1593_s1, 8192 }
  0x10   : > { %s1604_s9 = scalar_select %p1296_p10, 1, 0 }
  0x11   : > { %s194_s11 = sshll.u32 %s1204_s10, 4  ;;  %p1055_p11 = pneg %p1296_p10  ;;  %s195_s11 = int_to_ptr.vmem [resolvable:$true] %s194_s11 }
  0x12   : > { %p1109_p13 = scmp.ne.s32.totalorder %s1593_s1, %s1108_s15  ;;  %p1115_p3 = scmp.lt.u32.totalorder %s1108_s15, %s1593_s1 }
  0x13   : > { %p1304_p12 = pnand %p1599_p9, %p1055_p11 }
  0x15   : > { %p1110_p0 = pneg %p1304_p12 }
  0x17   : > { %p1111_p1 = pnand %p1110_p0, %p1109_p13 }
  0x19   : > { %p1112_p2 = pneg %p1111_p1 }
  0x1b   : > { %p1117_p4 = pnand %p1115_p3, %p1112_p2 }
  0x1d   : > { %1120 = shalt.err (!%p1117_p4)
}
  0x1e   : > { %s1121_s20 = scalar_lea.vmem %s195_s11, 8192  ;;  %p1129_p9 = scmp.lt.s32.totalorder %s195_s11, %s195_s11 }
  0x1f   : > { %p1122_p7 = scmp.ne.s32.totalorder %s195_s11, %s1121_s20  ;;  %p1130_p6 = scmp.lt.s32.totalorder %s1121_s20, %s1121_s20 }
  0x21   : > { %p1124_p8 = pnand %p1122_p7, %p1110_p0  ;;  %p1131_p5 = por %p1130_p6, %p1129_p9 }
  0x23   : > { %p1125_p11 = pneg %p1124_p8 }
  0x25   : > { %p1132_p10 = pnand %p1131_p5, %p1125_p11 }
  0x27   : > { %1135 = shalt.err (!%p1132_p10)
}
  0x28   : > { %s1205_s26 = smov 256   ;;  %s1206_s28 = smov 16  }
  0x29   : > { %1058 = dma.hbm_to_vmem [thread:$0]  (!%p1304_p12), %s1593_s1, 8192, %s195_s11, [#allocation3], %s1205_s26, %s1205_s26, %s1206_s28  }
  0x2a   : > { %p1606_p13 = scmp.ne.s32.totalorder %s1604_s9, 0 }
  0x2b   : > { %p1607_p1 = scmp.eq.s32.totalorder (!%p1606_p13), %s1268_s25, 0 }
  0x2c   : > { %230 = sbr.rel (%p1606_p13) target bundleno = 970 (0x3ca), region = 44 }
  0x33   : > { %1181 = dma.done.wait (%p1607_p1), [#allocation3], 8192   ;;  %p1608_p0 = pmov %p1607_p1 }
  0x34   : > { %p260_p5 = scmp.lt.s32.totalorder %s1268_s25, 1  ;;  %v1207_v0 = vmov 0.0   ;;  %vm349_vm0 = vcmask 1043456   ;;  %v330_v3 = vld [vmem:[%s1594_s2] sm:$0xff]  ;;  %v266_v4 = vld [vmem:[#allocation2 + $0x8] sm:$0xff]  ;;  %vm336_vm1 = vcmask 31744  }
  0x35   : > { %1183 = vsyncadd (%p1608_p0), [#allocation3], 4294959104  ;;  %418 = vmatprep.mubr.f32.mxu1 %v1207_v0  ;;  %645 = vmatprep.mubr.f32.mxu0 %v1207_v0  ;;  %v268_v5 = vld [vmem:[#allocation2 + $0x18] sm:$0xff]  ;;  %v265_v6 = vld [vmem:[#allocation2] sm:$0xff]  ;;  %vm568_vm2 = vcmask 261120   ;;  %s257_s17 = sand.u32 1, %s1194_s22  }
  0x36   : > { %s261_s12 = scalar_select %p260_p5, %s1268_s25, 1  ;;  %v267_v7 = vld [vmem:[#allocation2 + $0x10] sm:$0xff]  ;;  %v1340_v8 = vpack.c.bf16 %v268_v5, %v266_v4  ;;  %v270_v10 = vld [vmem:[#allocation2 + $0x28] sm:$0xff]  ;;  %v272_v11 = vld [vmem:[#allocation2 + $0x38] sm:$0xff] }
  0x37   : > { %v1342_v9 = vpack.c.bf16 %v267_v7, %v265_v6  ;;  %v269_v12 = vld [vmem:[#allocation2 + $0x20] sm:$0xff]  ;;  %v1344_v13 = vpack.c.bf16 %v272_v11, %v270_v10  ;;  %v271_v14 = vld [vmem:[#allocation2 + $0x30] sm:$0xff]  ;;  %v274_v15 = vld [vmem:[#allocation2 + $0x48] sm:$0xff]  ;;  %s893_s18 = sshll.u32 %s257_s17, 6  ;;  %s912_s26 = sshll.u32 %s1268_s25, 10 }
  0x38   : > { %s911_s13 = sshll.u32 %s261_s12, 3  ;;  %v276_v16 = vld [vmem:[#allocation2 + $0x58] sm:$0xff]  ;;  %v331_v17 = vld [vmem:[%s1594_s2 + $0x8] sm:$0xff]  ;;  %v1353_v18 = vpack.c.bf16 %v271_v14, %v269_v12  ;;  %v273_v20 = vld [vmem:[#allocation2 + $0x40] sm:$0xff]  ;;  %s1530_s19 = scalar_lea.vmem [#allocation5], %s893_s18 }
  0x39   : > { %s264_s9 = scalar_lea.vmem %s1592_s0, %s911_s13  ;;  %v1356_v19 = vpack.c.bf16 %v276_v16, %v274_v15  ;;  %v275_v21 = vld [vmem:[#allocation2 + $0x50] sm:$0xff]  ;;  %v278_v22 = vld [vmem:[#allocation2 + $0x68] sm:$0xff]  ;;  %v280_v23 = vld [vmem:[#allocation2 + $0x78] sm:$0xff]  ;;  %s813_s20 = sshll.u32 %s1530_s19, 4  ;;  %s1540_s20 = int_to_ptr.vmem [resolvable:$true] %s813_s20 }
  0x3a   : > { %v329_v1 = vld [vmem:[%s264_s9] sm:$0xff]  ;;  %v332_v24 = vld [vmem:[%s1594_s2 + $0x10] sm:$0xff]  ;;  %v1364_v25 = vpack.c.bf16 %v275_v21, %v273_v20  ;;  %v1367_v26 = vpack.c.bf16 %v280_v23, %v278_v22  ;;  %v282_v29 = vld [vmem:[#allocation2 + $0x88] sm:$0xff]  ;;  %s1545_s10 = scalar_lea.hbm %s1598_s6, %s912_s26  ;;  %s1551_s25 = scalar_lea.sflag [#allocation4], %s257_s17 }
  0x3b   : > { %v335_v2 = vcombine.high %v329_v1, %v329_v1  ;;  %v277_v27 = vld [vmem:[#allocation2 + $0x60] sm:$0xff]  ;;  %v279_v28 = vld [vmem:[#allocation2 + $0x70] sm:$0xff]  ;;  %v284_v30 = vld [vmem:[#allocation2 + $0x98] sm:$0xff]  ;;  %s1136_s12 = scalar_lea.vmem %s1540_s20, 1024  ;;  %p1609_p9 = scmp.ne.s32.totalorder %s1602_s7, 0 }
  0x3c   : > { %v333_v31 = vld [vmem:[%s1594_s2 + $0x18] sm:$0xff]  ;;  %v1375_v32 = vpack.c.bf16 %v279_v28, %v277_v27  ;;  %v1378_v33 = vpack.c.bf16 %v284_v30, %v282_v29  ;;  %v281_v34 = vld [vmem:[#allocation2 + $0x80] sm:$0xff]  ;;  %v283_v35 = vld [vmem:[#allocation2 + $0x90] sm:$0xff]  ;;  %p1137_p6 = scmp.ne.s32.totalorder %s1540_s20, %s1136_s12  ;;  %s1209_s13 = smov [#allocation5]  }
  0x3d   : > { %896 = vmatprep.subr.msk.mxu1 %vm349_vm0, %v335_v2  ;;  %v286_v36 = vld [vmem:[#allocation2 + $0xa8] sm:$0xff]  ;;  %v288_v37 = vld [vmem:[#allocation2 + $0xb8] sm:$0xff]  ;;  %v1382_v38 = vpack.c.bf16 %v283_v35, %v281_v34  ;;  %v285_v40 = vld [vmem:[#allocation2 + $0xa0] sm:$0xff]  ;;  %s1140_s11 = sshll.u32 %s1209_s13, 4  ;;  %s1141_s11 = int_to_ptr.vmem [resolvable:$false] %s1140_s11 }
  0x3e   : > { %897 = vmatpush1.msk.msra.mxu1 %vm349_vm0, %v329_v1  ;;  %v1385_v39 = vpack.c.bf16 %v288_v37, %v286_v36  ;;  %v287_v41 = vld [vmem:[#allocation2 + $0xb0] sm:$0xff]  ;;  %v290_v42 = vld [vmem:[#allocation2 + $0xc8] sm:$0xff]  ;;  %v292_v43 = vld [vmem:[#allocation2 + $0xd8] sm:$0xff]  ;;  %p1138_p10 = pnand %p1137_p6, %p1609_p9  ;;  %s1142_s14 = scalar_lea.vmem %s1141_s11, 2048 }
  0x3f   : > { %898 = vmatmul.mubr.msk.f32.vlgmr.msra.gmra.mrb[0].mxu1 %vm336_vm1, %v330_v3  ;;  %914 = vmatprep.subr.bf16.mxu1 %v1340_v8  ;;  %v1388_v44 = vpack.c.bf16 %v287_v41, %v285_v40  ;;  %v1391_v45 = vpack.c.bf16 %v292_v43, %v290_v42  ;;  %v289_v46 = vld [vmem:[#allocation2 + $0xc0] sm:$0xff]  ;;  %v291_v47 = vld [vmem:[#allocation2 + $0xd0] sm:$0xff]  ;;  %v294_v48 = vld [vmem:[#allocation2 + $0xe8] sm:$0xff]  ;;  %p1143_p2 = scmp.lt.s32.totalorder %s1540_s20, %s1141_s11  ;;  %p1144_p3 = scmp.lt.s32.totalorder %s1142_s14, %s1136_s12 }
  0x40   : > { %424 = vmatprep.mubr.f32.mxu1 %v1207_v0  ;;  %916 = vmatpush1.bf16.msra.mxu1 %v1342_v9  ;;  %v296_v49 = vld [vmem:[#allocation2 + $0xf8] sm:$0xff]  ;;  %v1394_v50 = vpack.c.bf16 %v291_v47, %v289_v46  ;;  %v293_v52 = vld [vmem:[#allocation2 + $0xe0] sm:$0xff]  ;;  %v295_v53 = vld [vmem:[#allocation2 + $0xf0] sm:$0xff]  ;;  %p1139_p12 = pneg %p1138_p10 }
  0x41   : > { %918 = vmatprep.subr.bf16.mxu1 %v1344_v13  ;;  %v1397_v51 = vpack.c.bf16 %v296_v49, %v294_v48  ;;  %v298_v54 = vld [vmem:[#allocation2 + $0x108] sm:$0xff]  ;;  %v300_v55 = vld [vmem:[#allocation2 + $0x118] sm:$0xff]  ;;  %v1400_v56 = vpack.c.bf16 %v295_v53, %v293_v52  ;;  %v297_v58 = vld [vmem:[#allocation2 + $0x100] sm:$0xff]  ;;  %p1145_p4 = por %p1144_p3, %p1143_p2 }
  0x42   : > { %v1403_v57 = vpack.c.bf16 %v300_v55, %v298_v54  ;;  %v299_v59 = vld [vmem:[#allocation2 + $0x110] sm:$0xff]  ;;  %v302_v60 = vld [vmem:[#allocation2 + $0x128] sm:$0xff]  ;;  %v304_v61 = vld [vmem:[#allocation2 + $0x138] sm:$0xff] }
  0x43   : > { %899 = vmatmul.mubr.msk.f32.gmra.mrb[2].mxu1 %vm336_vm1, %v331_v17  ;;  %v1406_v62 = vpack.c.bf16 %v299_v59, %v297_v58  ;;  %v1409_v63 = vpack.c.bf16 %v304_v61, %v302_v60  ;;  %v301_v1 = vld [vmem:[#allocation2 + $0x120] sm:$0xff]  ;;  %v303_v2 = vld [vmem:[#allocation2 + $0x130] sm:$0xff]  ;;  %v306_v3 = vld [vmem:[#allocation2 + $0x148] sm:$0xff]  ;;  %v1208_v59 = vmov 0   ;;  %p1146_p7 = pnand %p1145_p4, %p1139_p12 }
  0x44   : > { %430 = vmatprep.mubr.f32.mxu1 %v1207_v0  ;;  %920 = vmatpush1.bf16.msra.mxu1 %v1353_v18  ;;  %v308_v4 = vld [vmem:[#allocation2 + $0x158] sm:$0xff]  ;;  %v1412_v5 = vpack.c.bf16 %v303_v2, %v301_v1  ;;  %v305_v7 = vld [vmem:[#allocation2 + $0x140] sm:$0xff]  ;;  %v307_v10 = vld [vmem:[#allocation2 + $0x150] sm:$0xff] }
  0x45   : > { %922 = vmatprep.subr.bf16.mxu1 %v1356_v19  ;;  %v1415_v6 = vpack.c.bf16 %v308_v4, %v306_v3  ;;  %v310_v11 = vld [vmem:[#allocation2 + $0x168] sm:$0xff]  ;;  %v312_v12 = vld [vmem:[#allocation2 + $0x178] sm:$0xff]  ;;  %v1418_v14 = vpack.c.bf16 %v307_v10, %v305_v7  ;;  %v309_v16 = vld [vmem:[#allocation2 + $0x160] sm:$0xff]  ;;  %1105 = vset.pattern.permute.xlu0 %v1208_v59 }
  0x46   : > { %v1421_v15 = vpack.c.bf16 %v312_v12, %v310_v11  ;;  %v311_v17 = vld [vmem:[#allocation2 + $0x170] sm:$0xff]  ;;  %v314_v20 = vld [vmem:[#allocation2 + $0x188] sm:$0xff]  ;;  %v316_v21 = vld [vmem:[#allocation2 + $0x198] sm:$0xff]  ;;  %1106 = vset.pattern.permute.xlu1 %v1208_v59 }
  0x47   : > { %900 = vmatmul.mubr.msk.f32.gmra.mrb[4].mxu1 %vm336_vm1, %v332_v24  ;;  %v1424_v22 = vpack.c.bf16 %v311_v17, %v309_v16  ;;  %v1427_v23 = vpack.c.bf16 %v316_v21, %v314_v20  ;;  %v313_v24 = vld [vmem:[#allocation2 + $0x180] sm:$0xff]  ;;  %v315_v27 = vld [vmem:[#allocation2 + $0x190] sm:$0xff]  ;;  %v318_v28 = vld [vmem:[#allocation2 + $0x1a8] sm:$0xff] }
  0x48   : > { %436 = vmatprep.mubr.f32.mxu1 %v1207_v0  ;;  %924 = vmatpush1.bf16.msra.mxu1 %v1364_v25  ;;  %v320_v29 = vld [vmem:[#allocation2 + $0x1b8] sm:$0xff]  ;;  %v1430_v30 = vpack.c.bf16 %v315_v27, %v313_v24  ;;  %v317_v34 = vld [vmem:[#allocation2 + $0x1a0] sm:$0xff]  ;;  %v319_v35 = vld [vmem:[#allocation2 + $0x1b0] sm:$0xff] }
  0x49   : > { %926 = vmatprep.subr.bf16.mxu1 %v1367_v26  ;;  %v322_v36 = vld [vmem:[#allocation2 + $0x1c8] sm:$0xff]  ;;  %v324_v37 = vld [vmem:[#allocation2 + $0x1d8] sm:$0xff]  ;;  %v1436_v40 = vpack.c.bf16 %v319_v35, %v317_v34  ;;  %v321_v42 = vld [vmem:[#allocation2 + $0x1c0] sm:$0xff] }
  0x4a   : > { %v1439_v41 = vpack.c.bf16 %v324_v37, %v322_v36  ;;  %v323_v43 = vld [vmem:[#allocation2 + $0x1d0] sm:$0xff]  ;;  %v326_v46 = vld [vmem:[#allocation2 + $0x1e8] sm:$0xff]  ;;  %v328_v47 = vld [vmem:[#allocation2 + $0x1f8] sm:$0xff] }
  0x4b   : > { %901 = vmatmul.mubr.msk.f32.gmra.mrb[6].mxu1 %vm336_vm1, %v333_v31  ;;  %v1433_v31 = vpack.c.bf16 %v320_v29, %v318_v28  ;;  %v1442_v48 = vpack.c.bf16 %v323_v43, %v321_v42  ;;  %v1445_v49 = vpack.c.bf16 %v328_v47, %v326_v46  ;;  %v325_v52 = vld [vmem:[#allocation2 + $0x1e0] sm:$0xff]  ;;  %v327_v53 = vld [vmem:[#allocation2 + $0x1f0] sm:$0xff]  ;;  %v444_v60 = vld [vmem:[%s1595_s3 + $0x8] sm:$0xff] }
  0x4c   : > { %928 = vmatpush1.bf16.msra.mxu1 %v1375_v32  ;;  %v1449_v54 = vpack.c.bf16 %v327_v53, %v325_v52  ;;  %v443_v55 = vld [vmem:[%s1595_s3] sm:$0xff]  ;;  %v445_v58 = vld [vmem:[%s1595_s3 + $0x10] sm:$0xff]  ;;  %v446_v61 = vld [vmem:[%s1595_s3 + $0x18] sm:$0xff] }
  0x4d   : > { %930 = vmatprep.subr.bf16.mxu1 %v1378_v33  ;;  %449 = vperm.xlu0 %1105, %v443_v55   ;;  %v670_v1 = vld [vmem:[%s1597_s5] sm:$0xff]  ;;  %v671_v2 = vld [vmem:[%s1597_s5 + $0x8] sm:$0xff]  ;;  %v672_v3 = vld [vmem:[%s1597_s5 + $0x10] sm:$0xff] }
  0x4e   : > { %459 = vperm.xlu1 %1106, %v445_v58   ;;  %v673_v4 = vld [vmem:[%s1597_s5 + $0x18] sm:$0xff] }
  0x50   : > { %932 = vmatpush1.bf16.msra.mxu1 %v1382_v38 }
  0x51   : > { %934 = vmatprep.subr.bf16.mxu1 %v1385_v39  ;;  %454 = vperm.xlu0 %1105, %v444_v60  }
  0x52   : > { %464 = vperm.xlu1 %1106, %v446_v61  }
  0x54   : > { %936 = vmatpush1.bf16.msra.mxu1 %v1388_v44 }
  0x55   : > { %938 = vmatprep.subr.bf16.mxu1 %v1391_v45  ;;  %676 = vperm.xlu0 %1105, %v670_v1  }
  0x56   : > { %681 = vperm.xlu1 %1106, %v671_v2  }
  0x58   : > { %940 = vmatpush1.bf16.msra.mxu1 %v1394_v50 }
  0x59   : > { %942 = vmatprep.subr.bf16.mxu1 %v1397_v51  ;;  %686 = vperm.xlu0 %1105, %v672_v3  }
  0x5a   : > { %691 = vperm.xlu1 %1106, %v673_v4  }
  0x5c   : > { %944 = vmatpush1.bf16.msra.mxu1 %v1400_v56 }
  0x5d   : > { %946 = vmatprep.subr.bf16.mxu1 %v1403_v57 }
  0x60   : > { %948 = vmatpush1.bf16.msra.mxu1 %v1406_v62 }
  0x61   : > { %950 = vmatprep.subr.bf16.mxu1 %v1409_v63 }
  0x64   : > { %952 = vmatpush1.bf16.msra.mxu1 %v1412_v5 }
  0x65   : > { %954 = vmatprep.subr.bf16.mxu1 %v1415_v6 }
  0x68   : > { %956 = vmatpush1.bf16.msra.mxu1 %v1418_v14 }
  0x69   : > { %958 = vmatprep.subr.bf16.mxu1 %v1421_v15 }
  0x6c   : > { %960 = vmatpush1.bf16.msra.mxu1 %v1424_v22 }
  0x6d   : > { %962 = vmatprep.subr.bf16.mxu1 %v1427_v23 }
  0x70   : > { %964 = vmatpush1.bf16.msra.mxu1 %v1430_v30 }
  0x71   : > { %966 = vmatprep.subr.bf16.mxu1 %v1433_v31 }
  0x74   : > { %968 = vmatpush1.bf16.msra.mxu1 %v1436_v40 }
  0x75   : > { %970 = vmatprep.subr.bf16.mxu1 %v1439_v41 }
  0x78   : > { %972 = vmatpush1.bf16.msra.mxu1 %v1442_v48 }
  0x79   : > { %974 = vmatprep.subr.bf16.mxu1 %v1445_v49 }
  0x7c   : > { %976 = vmatpush1.bf16.msra.mxu1 %v1449_v54 }
  0xcc   : > { %v450_v24 = vpop.permute.xlu0 %449 }
  0xcd   : > { %v460_v43 = vpop.permute.xlu1 %459 }
  0xd0   : > { %v455_v34 = vpop.permute.xlu0 %454 }
  0xd1   : > { %v465_v2 = vpop.permute.xlu1 %464 }
 0x112   : > { %v420_v7 = vpop.f32.mrb[0].mxu1 }
 0x113   : > { %v422_v10 = vpop.f32.mrb[1].mxu1 }
 0x114   : > { %531 = vmatprep.mubr.f32.mxu1 %v422_v10 }
 0x115   : > { %532 = vmatmul.mubr.f32.vlgmr.msra.gmra.mrb[8].mxu1 %v420_v7 }
 0x116   : > { %v426_v11 = vpop.f32.mrb[2].mxu1 }
 0x117   : > { %v428_v12 = vpop.f32.mrb[3].mxu1 }
 0x118   : > { %537 = vmatprep.mubr.f32.mxu1 %v428_v12 }
 0x119   : > { %538 = vmatmul.mubr.f32.gmra.mrb[10].mxu1 %v426_v11 }
 0x11a   : > { %v432_v16 = vpop.f32.mrb[4].mxu1 }
 0x11b   : > { %v434_v17 = vpop.f32.mrb[5].mxu1 }
 0x11c   : > { %543 = vmatprep.mubr.f32.mxu1 %v434_v17 }
 0x11d   : > { %544 = vmatmul.mubr.f32.gmra.mrb[12].mxu1 %v432_v16 }
 0x11e   : > { %v438_v20 = vpop.f32.mrb[6].mxu1 }
 0x11f   : > { %v440_v21 = vpop.f32.mrb[7].mxu1 }
 0x120   : > { %549 = vmatprep.mubr.f32.mxu1 %v440_v21 }
 0x121   : > { %550 = vmatmul.mubr.f32.gmra.mrb[14].mxu1 %v438_v20 }
 0x1e8   : > { %v533_v27 = vpop.f32.mrb[8].mxu1 }
 0x1e9   : > { %v535_v28 = vpop.f32.mrb[9].mxu1  ;;  %v534_v29 = vadd.f32 %v533_v27, %v450_v24  ;;  %v564_v27 = vld [vmem:[%s1596_s4] sm:$0xff] }
 0x1ea   : > { %v536_v35 = vadd.f32 %v535_v28, %v450_v24  ;;  %v565_v28 = vld [vmem:[%s1596_s4 + $0x8] sm:$0xff] }
 0x1eb   : > { %v556_v47 = vmax.f32 %v534_v29, 0.0 }
 0x1ec   : > { %v539_v36 = vpop.f32.mrb[10].mxu1  ;;  %v557_v53 = vmax.f32 %v536_v35, 0.0 }
 0x1ed   : > { %v540_v37 = vadd.f32 %v539_v36, %v455_v34  ;;  %v541_v42 = vpop.f32.mrb[11].mxu1 }
 0x1ee   : > { %v542_v46 = vadd.f32 %v541_v42, %v455_v34 }
 0x1ef   : > { %v558_v52 = vmax.f32 %v540_v37, 0.0 }
 0x1f0   : > { %v559_v55 = vmax.f32 %v542_v46, 0.0  ;;  %v545_v58 = vpop.f32.mrb[12].mxu1 }
 0x1f1   : > { %v547_v59 = vpop.f32.mrb[13].mxu1  ;;  %v979_v60 = vpack.c.bf16 %v558_v52, %v556_v47  ;;  %v546_v1 = vadd.f32 %v545_v58, %v460_v43 }
 0x1f2   : > { %v977_v61 = vpack.c.bf16 %v559_v55, %v557_v53  ;;  %v548_v3 = vadd.f32 %v547_v59, %v460_v43 }
 0x1f3   : > { %v560_v12 = vmax.f32 %v546_v1, 0.0 }
 0x1f4   : > { %v551_v4 = vpop.f32.mrb[14].mxu1  ;;  %978 = vmatprep.subr.bf16.mxu0 %v977_v61  ;;  %v561_v17 = vmax.f32 %v548_v3, 0.0 }
 0x1f5   : > { %v552_v7 = vadd.f32 %v551_v4, %v465_v2  ;;  %v553_v10 = vpop.f32.mrb[15].mxu1  ;;  %980 = vmatpush1.bf16.msra.mxu0 %v979_v60 }
 0x1f6   : > { %v554_v11 = vadd.f32 %v553_v10, %v465_v2 }
 0x1f7   : > { %v562_v16 = vmax.f32 %v552_v7, 0.0 }
 0x1f8   : > { %v563_v20 = vmax.f32 %v554_v11, 0.0 }
 0x1f9   : > { %v983_v21 = vpack.c.bf16 %v562_v16, %v560_v12 }
 0x1fa   : > { %v981_v24 = vpack.c.bf16 %v563_v20, %v561_v17 }
 0x1fc   : > { %982 = vmatprep.subr.bf16.mxu0 %v981_v24 }
 0x1fd   : > { %984 = vmatpush1.bf16.msra.mxu0 %v983_v21 }
 0x1fe   : > { %986 = vmatprep.subr.bf16.mxu0 %v1340_v8  ;;  %v566_v8 = vld [vmem:[%s1596_s4 + $0x10] sm:$0xff] }
 0x200   : > { %902 = vmatmul.mubr.msk.f32.vlgmr.msra.gmra.mrb[0].mxu0 %vm568_vm2, %v564_v27 }
 0x201   : > { %651 = vmatprep.mubr.f32.mxu0 %v1207_v0  ;;  %988 = vmatpush1.bf16.msra.mxu0 %v1342_v9  ;;  %v567_v9 = vld [vmem:[%s1596_s4 + $0x18] sm:$0xff] }
 0x202   : > { %990 = vmatprep.subr.bf16.mxu0 %v1344_v13 }
 0x204   : > { %903 = vmatmul.mubr.msk.f32.gmra.mrb[2].mxu0 %vm568_vm2, %v565_v28 }
 0x205   : > { %657 = vmatprep.mubr.f32.mxu0 %v1207_v0  ;;  %992 = vmatpush1.bf16.msra.mxu0 %v1353_v18 }
 0x206   : > { %994 = vmatprep.subr.bf16.mxu0 %v1356_v19 }
 0x208   : > { %904 = vmatmul.mubr.msk.f32.gmra.mrb[4].mxu0 %vm568_vm2, %v566_v8 }
 0x209   : > { %663 = vmatprep.mubr.f32.mxu0 %v1207_v0  ;;  %996 = vmatpush1.bf16.msra.mxu0 %v1364_v25 }
 0x20a   : > { %998 = vmatprep.subr.bf16.mxu0 %v1367_v26 }
 0x20c   : > { %905 = vmatmul.mubr.msk.f32.gmra.mrb[6].mxu0 %vm568_vm2, %v567_v9 }
 0x20d   : > { %1000 = vmatpush1.bf16.msra.mxu0 %v1375_v32 }
 0x20e   : > { %1002 = vmatprep.subr.bf16.mxu0 %v1378_v33 }
 0x211   : > { %1004 = vmatpush1.bf16.msra.mxu0 %v1382_v38  ;;  %v677_v38 = vpop.permute.xlu0 %676 }
 0x212   : > { %1006 = vmatprep.subr.bf16.mxu0 %v1385_v39 }
 0x215   : > { %1008 = vmatpush1.bf16.msra.mxu0 %v1388_v44 }
 0x216   : > { %1010 = vmatprep.subr.bf16.mxu0 %v1391_v45 }
 0x219   : > { %1012 = vmatpush1.bf16.msra.mxu0 %v1394_v50 }
 0x21a   : > { %1014 = vmatprep.subr.bf16.mxu0 %v1397_v51 }
 0x21d   : > { %1016 = vmatpush1.bf16.msra.mxu0 %v1400_v56  ;;  %v682_v56 = vpop.permute.xlu1 %681 }
 0x21e   : > { %1018 = vmatprep.subr.bf16.mxu0 %v1403_v57 }
 0x221   : > { %1020 = vmatpush1.bf16.msra.mxu0 %v1406_v62 }
 0x222   : > { %1022 = vmatprep.subr.bf16.mxu0 %v1409_v63 }
 0x225   : > { %1024 = vmatpush1.bf16.msra.mxu0 %v1412_v5 }
 0x226   : > { %1026 = vmatprep.subr.bf16.mxu0 %v1415_v6 }
 0x229   : > { %1028 = vmatpush1.bf16.msra.mxu0 %v1418_v14 }
 0x22a   : > { %1030 = vmatprep.subr.bf16.mxu0 %v1421_v15  ;;  %v687_v15 = vpop.permute.xlu0 %686 }
 0x22d   : > { %1032 = vmatpush1.bf16.msra.mxu0 %v1424_v22 }
 0x22e   : > { %1034 = vmatprep.subr.bf16.mxu0 %v1427_v23 }
 0x231   : > { %1036 = vmatpush1.bf16.msra.mxu0 %v1430_v30 }
 0x232   : > { %1038 = vmatprep.subr.bf16.mxu0 %v1433_v31 }
 0x235   : > { %1040 = vmatpush1.bf16.msra.mxu0 %v1436_v40 }
 0x236   : > { %1042 = vmatprep.subr.bf16.mxu0 %v1439_v41 }
 0x239   : > { %1044 = vmatpush1.bf16.msra.mxu0 %v1442_v48  ;;  %v692_v48 = vpop.permute.xlu1 %691 }
 0x23a   : > { %1046 = vmatprep.subr.bf16.mxu0 %v1445_v49 }
 0x23d   : > { %1048 = vmatpush1.bf16.msra.mxu0 %v1449_v54 }
 0x2d3   : > { %v647_v0 = vpop.f32.mrb[0].mxu0 }
 0x2d4   : > { %v649_v13 = vpop.f32.mrb[1].mxu0 }
 0x2d5   : > { %758 = vmatprep.mubr.f32.mxu0 %v649_v13 }
 0x2d6   : > { %759 = vmatmul.mubr.f32.vlgmr.msra.gmra.mrb[8].mxu0 %v647_v0 }
 0x2d7   : > { %v653_v18 = vpop.f32.mrb[2].mxu0 }
 0x2d8   : > { %v655_v19 = vpop.f32.mrb[3].mxu0 }
 0x2d9   : > { %764 = vmatprep.mubr.f32.mxu0 %v655_v19 }
 0x2da   : > { %765 = vmatmul.mubr.f32.gmra.mrb[10].mxu0 %v653_v18 }
 0x2db   : > { %v659_v25 = vpop.f32.mrb[4].mxu0 }
 0x2dc   : > { %v661_v26 = vpop.f32.mrb[5].mxu0 }
 0x2dd   : > { %770 = vmatprep.mubr.f32.mxu0 %v661_v26 }
 0x2de   : > { %771 = vmatmul.mubr.f32.gmra.mrb[12].mxu0 %v659_v25 }
 0x2df   : > { %v665_v32 = vpop.f32.mrb[6].mxu0 }
 0x2e0   : > { %v667_v33 = vpop.f32.mrb[7].mxu0 }
 0x2e1   : > { %776 = vmatprep.mubr.f32.mxu0 %v667_v33 }
 0x2e2   : > { %777 = vmatmul.mubr.f32.gmra.mrb[14].mxu0 %v665_v32 }
 0x3a9   : > { %v760_v39 = vpop.f32.mrb[8].mxu0 }
 0x3aa   : > { %v761_v44 = vadd.f32 %v760_v39, %v677_v38  ;;  %v762_v45 = vpop.f32.mrb[9].mxu0 }
 0x3ab   : > { %v763_v50 = vadd.f32 %v762_v45, %v677_v38 }
 0x3ac   : > { %v783_v51 = vmax.f32 %v761_v44, 0.0 }
 0x3ad   : > { %v784_v57 = vmax.f32 %v763_v50, 0.0  ;;  %v766_v62 = vpop.f32.mrb[10].mxu0 }
 0x3ae   : > { %791 = vst [vmem:[%s1530_s19] sm:$0xff] %v783_v51  ;;  %v767_v63 = vadd.f32 %v766_v62, %v682_v56  ;;  %v768_v5 = vpop.f32.mrb[11].mxu0 }
 0x3af   : > { %792 = vst [vmem:[%s1530_s19 + $0x8] sm:$0xff] %v784_v57  ;;  %v769_v6 = vadd.f32 %v768_v5, %v682_v56 }
 0x3b0   : > { %v785_v14 = vmax.f32 %v767_v63, 0.0 }
 0x3b1   : > { %v786_v22 = vmax.f32 %v769_v6, 0.0  ;;  %v772_v23 = vpop.f32.mrb[12].mxu0 }
 0x3b2   : > { %793 = vst [vmem:[%s1530_s19 + $0x10] sm:$0xff] %v785_v14  ;;  %v773_v30 = vadd.f32 %v772_v23, %v687_v15  ;;  %v774_v31 = vpop.f32.mrb[13].mxu0 }
 0x3b3   : > { %794 = vst [vmem:[%s1530_s19 + $0x18] sm:$0xff] %v786_v22  ;;  %v775_v40 = vadd.f32 %v774_v31, %v687_v15 }
 0x3b4   : > { %v787_v41 = vmax.f32 %v773_v30, 0.0 }
 0x3b5   : > { %v788_v49 = vmax.f32 %v775_v40, 0.0  ;;  %v778_v54 = vpop.f32.mrb[14].mxu0 }
 0x3b6   : > { %795 = vst [vmem:[%s1530_s19 + $0x20] sm:$0xff] %v787_v41  ;;  %v779_v29 = vadd.f32 %v778_v54, %v692_v48  ;;  %v780_v34 = vpop.f32.mrb[15].mxu0 }
 0x3b7   : > { %796 = vst [vmem:[%s1530_s19 + $0x28] sm:$0xff] %v788_v49  ;;  %v781_v35 = vadd.f32 %v780_v34, %v692_v48 }
 0x3b8   : > { %v789_v36 = vmax.f32 %v779_v29, 0.0 }
 0x3b9   : > { %v790_v37 = vmax.f32 %v781_v35, 0.0 }
 0x3ba   : > { %797 = vst [vmem:[%s1530_s19 + $0x30] sm:$0xff] %v789_v36 }
 0x3bb   : > { %798 = vst [vmem:[%s1530_s19 + $0x38] sm:$0xff] %v790_v37 }
 0x3bc   : > { %1149 = shalt.err (!%p1146_p7)
}
 0x3bd   : > { %s1150_s9 = scalar_lea.hbm %s1545_s10, 1024  ;;  %s1154_s17 = scalar_lea.hbm %s1598_s6, 2048 }
 0x3be   : > { %p1151_p8 = scmp.ne.s32.totalorder %s1545_s10, %s1150_s9  ;;  %p1155_p1 = scmp.lt.u32.totalorder %s1545_s10, %s1598_s6 }
 0x3bf   : > { %p1156_p0 = scmp.lt.u32.totalorder %s1154_s17, %s1150_s9  ;;  %p1158_p6 = scmp.lt.u32.totalorder %s1150_s9, %s1545_s10 }
 0x3c0   : > { %p1152_p11 = pnand %p1151_p8, %p1609_p9 }
 0x3c1   : > { %p1157_p5 = por %p1156_p0, %p1155_p1 }
 0x3c2   : > { %p1153_p13 = pneg %p1152_p11 }
 0x3c3   : > { %p1159_p10 = por %p1158_p6, %p1157_p5 }
 0x3c5   : > { %p1160_p12 = pnand %p1159_p10, %p1153_p13 }
 0x3c7   : > { %1163 = shalt.err (!%p1160_p12)
}
 0x3c8   : > { %s1210_s26 = smov 256   ;;  %s1211_s28 = smov 16  }
 0x3c9   : > { %1053 = dma.vmem_to_hbm [thread:$0]  (%p1609_p9), %s1540_s20, 1024, %s1545_s10, %s1551_s25, %s1210_s26, %s1210_s26, %s1211_s28  }
 0x3ca PF: > { %p1065_p2 = scmp.ge.s32.totalorder %s1202_s24, 2  ;;  %s828_s29 = sand.u32 1, %s1190_s21  }
 0x3cb   : > { %p1610_p3 = scmp.ne.s32.totalorder %s1603_s8, 0  ;;  %s829_s12 = scalar_lea.sflag [#allocation4], %s828_s29 }
 0x3cd   : > { %p1060_p4 = pnand %p1065_p2, %p1610_p3 }
 0x3cf   : > { %1185 = dma.done.wait (!%p1060_p4), %s829_s12, 1024  }
 0x3d0   : > { %1187 = vsyncadd (!%p1060_p4), %s829_s12, 4294966272  ;;  %p17_p7 = scmp.ge.s32.totalorder %s1272_s27, 4   ;;  %s1611_s21 = smov %s1194_s22 }
 0x3d1   : > { %s1612_s22 = smov %s1198_s23  ;;  %s1613_s23 = smov %s1283_s30 }
 0x3d2   : > { %s1614_s24 = smov %s1272_s27  ;;  %19 = sbr.rel (!%p17_p7) target bundleno = 4 (0x4), region = 84 }
 0x3d9   :  { %834 = vsyncpa [#allocation3], 1 }
 0x3da   :  { %836 = vsyncpa [#allocation3 + $0x1], 1 }
 0x3db   :  { %837 = vsyncpa [#allocation4], 1 }
 0x3dc   :  { %839 = vsyncpa [#allocation4 + $0x1], 1 }

</bundles_post_ra>
